<compile_context>
chip_gen: v7x
topology: tpu7x:2x2x1
jax: 0.10.0
libtpu: 0.0.40
codegen_flags: <defaults>
</compile_context>

<pallas_src>
import functools

import jax
import jax.numpy as jnp
from jax.experimental import pallas as pl
from jax.experimental.pallas import tpu as pltpu

BN_EPS = 1e-5
LANE = 128


def _round_up(n, m):
    return ((n + m - 1) // m) * m


def _pad_last(a, target):
    pad = target - a.shape[-1]
    if pad <= 0:
        return a
    widths = [(0, 0)] * (a.ndim - 1) + [(0, pad)]
    return jnp.pad(a, widths)


def mlp_bn_kernel(x_ref, w1_ref, gamma_ref, beta_ref, w2_ref, b2_ref, o_ref):
    # ---- linear1: (B, In) f32 -> bf16 @ (In, H) bf16 -> f32 (MXU) ----
    # Linear-1 bias omitted: it cancels exactly under training-mode BatchNorm
    # (the batch mean absorbs it), so the forward output is unchanged.
    h = jnp.dot(x_ref[...].astype(jnp.bfloat16), w1_ref[...],
                preferred_element_type=jnp.float32)            # (B, H) f32

    # ---- BatchNorm1d, training-mode stats, one pass (sum / sum-of-squares) ----
    inv_b = 1.0 / h.shape[0]
    s = jnp.sum(h, axis=0, keepdims=True)                      # (1, H)
    ss = jnp.sum(h * h, axis=0, keepdims=True)                 # (1, H)
    mean = s * inv_b
    var = jnp.maximum(ss * inv_b - mean * mean, 0.0)           # biased var >= 0
    # fold BN into a single per-feature scale/shift (f32 VPU math)
    scale = gamma_ref[...] * jax.lax.rsqrt(var + BN_EPS)       # (1, H)
    shift = beta_ref[...] - mean * scale                       # (1, H)
    h_bn = h * scale + shift

    # ---- ReLU ----
    h_relu = jnp.maximum(h_bn, 0.0)

    # ---- linear2: (B, H) bf16 @ (H, O_p) bf16 -> f32 (MXU); lane-dense store ----
    o_ref[...] = jnp.dot(h_relu.astype(jnp.bfloat16), w2_ref[...],
                         preferred_element_type=jnp.float32) + b2_ref[...]


def prepare_params(params):
    """One-time prep: transpose, pad ONLY the output lane dim to 128, cast
    matmul weights to bf16.  b1 is intentionally dropped (cancels under BN)."""
    in_size = params["w1"].shape[1]
    hid = params["w1"].shape[0]
    out = params["w2"].shape[0]
    out_p = _round_up(out, LANE)

    # nn.Linear stores weight as (out_features, in_features) -> transpose for x @ W^T
    w1t = params["w1"].T.astype(jnp.bfloat16)                        # (In, H)
    w2t = _pad_last(params["w2"].T, out_p).astype(jnp.bfloat16)      # (H, O_p), pad cols = 0
    b2 = _pad_last(params["b2"][None, :], out_p).astype(jnp.float32)  # (1, O_p), pad = 0
    gamma = params["gamma"][None, :].astype(jnp.float32)             # (1, H)
    beta = params["beta"][None, :].astype(jnp.float32)               # (1, H)

    meta = dict(input_size=in_size, hidden_size=hid,
                output_size=out, out_p=out_p)
    return (w1t, gamma, beta, w2t, b2), meta


@jax.jit
def _forward_padded(x, w1t, gamma, beta, w2t, b2):
    """Single pallas_call; x goes in raw (no wrapper pad/cast ops), and the
    padded (B, out_p) f32 logits come out raw (consumer slices lazily)."""
    B = x.shape[0]
    out_p = w2t.shape[1]
    vmem = pl.BlockSpec(memory_space=pltpu.MemorySpace.VMEM)
    return pl.pallas_call(
        mlp_bn_kernel,
        out_shape=jax.ShapeDtypeStruct((B, out_p), jnp.float32),
        in_specs=[vmem] * 6,
        out_specs=vmem,
    )(x, w1t, gamma, beta, w2t, b2)


def mymodel_forward_padded(x, prepped):
    """x: (B, input_size) float32.  Returns padded (B, out_p) f32 logits;
    the real logits are the first `output_size` columns (slice at the
    consumer to keep the kernel's output store lane-dense and avoid a
    standalone slice dispatch)."""
    w1t, gamma, beta, w2t, b2 = prepped
    return _forward_padded(x, w1t, gamma, beta, w2t, b2)


def mymodel_forward(x, prepped, meta):
    """Convenience wrapper returning exactly (B, output_size)."""
    return mymodel_forward_padded(x, prepped)[:, :meta["output_size"]]


def init_params(key, input_size, hidden_size, output_size):
    """Deterministic init matching PyTorch nn.Linear / nn.BatchNorm1d defaults."""
    k1, k2, k3, k4 = jax.random.split(key, 4)
    bound1 = 1.0 / jnp.sqrt(input_size)
    bound2 = 1.0 / jnp.sqrt(hidden_size)
    return {
        # nn.Linear stores weight as (out_features, in_features)
        "w1": jax.random.uniform(k1, (hidden_size, input_size),
                                 jnp.float32, -bound1, bound1),
        "b1": jax.random.uniform(k2, (hidden_size,),
                                 jnp.float32, -bound1, bound1),
        "gamma": jnp.ones((hidden_size,), jnp.float32),   # BN weight
        "beta": jnp.zeros((hidden_size,), jnp.float32),   # BN bias
        "w2": jax.random.uniform(k3, (output_size, hidden_size),
                                 jnp.float32, -bound2, bound2),
        "b2": jax.random.uniform(k4, (output_size,),
                                 jnp.float32, -bound2, bound2),
    }


def reference_forward_f32(x, params):
    """Pure f32 JAX reference of the PyTorch module forward (training-mode BN)."""
    h = x @ params["w1"].T + params["b1"]
    mean = jnp.mean(h, axis=0, keepdims=True)
    var = jnp.mean((h - mean) ** 2, axis=0, keepdims=True)
    h = (h - mean) / jnp.sqrt(var + BN_EPS)
    h = h * params["gamma"] + params["beta"]
    h = jnp.maximum(h, 0.0)
    return h @ params["w2"].T + params["b2"]


def reference_forward_bf16(x, params):
    """Reference matching the kernel's bf16-input / f32-accumulate matmul recipe
    (still includes b1 — it cancels through the batch norm up to f32 rounding)."""
    h = jnp.dot(x.astype(jnp.bfloat16), params["w1"].T.astype(jnp.bfloat16),
                preferred_element_type=jnp.float32) + params["b1"]
    mean = jnp.mean(h, axis=0, keepdims=True)
    var = jnp.maximum(jnp.mean(h * h, axis=0, keepdims=True) - mean * mean, 0.0)
    h = (h - mean) * jax.lax.rsqrt(var + BN_EPS)
    h = h * params["gamma"] + params["beta"]
    h = jnp.maximum(h, 0.0)
    return jnp.dot(h.astype(jnp.bfloat16), params["w2"].T.astype(jnp.bfloat16),
                   preferred_element_type=jnp.float32) + params["b2"]


if __name__ == "__main__":
    # Small shapes consistent with the module's forward:
    batch, input_size, hidden_size, output_size = 8, 32, 64, 10

    key = jax.random.PRNGKey(0)
    k_x, k_p = jax.random.split(key)
    x = jax.random.normal(k_x, (batch, input_size), jnp.float32)
    params = init_params(k_p, input_size, hidden_size, output_size)

    prepped, meta = prepare_params(params)

    # Single kernel call; consumer slices the padded logits lazily.
    out_padded = mymodel_forward_padded(x, prepped)
    out_padded = jax.block_until_ready(out_padded)
    assert out_padded.shape == (batch, meta["out_p"])

    out = out_padded[:, :output_size]
    assert out.shape == (batch, output_size)

    # Pad columns of the output must be exactly zero (zero-padded w2/b2).
    assert jnp.allclose(out_padded[:, output_size:], 0.0)

    # Tight check vs a reference using the same bf16-input matmul recipe.
    ref_bf16 = reference_forward_bf16(x, params)
    assert jnp.allclose(out, ref_bf16, atol=2e-3, rtol=2e-3), \
        float(jnp.max(jnp.abs(out - ref_bf16)))

    # Looser sanity check vs the full-f32 PyTorch-semantics reference
    # (difference is purely bf16 matmul-input rounding).
    ref_f32 = reference_forward_f32(x, params)
    assert jnp.allclose(out, ref_f32, atol=5e-2, rtol=5e-2), \
        float(jnp.max(jnp.abs(out - ref_f32)))

    print("KERNEL_OK")
</pallas_src>

<mosaic_0001>
module attributes {stable_mosaic.version = 11 : i64} {
  func.func @mlp_bn_kernel(%arg0: memref<8x32xf32, #tpu.memory_space<vmem>>, %arg1: memref<32x64xbf16, #tpu.memory_space<vmem>>, %arg2: memref<1x64xf32, #tpu.memory_space<vmem>>, %arg3: memref<1x64xf32, #tpu.memory_space<vmem>>, %arg4: memref<64x128xbf16, #tpu.memory_space<vmem>>, %arg5: memref<1x128xf32, #tpu.memory_space<vmem>>, %arg6: memref<8x128xf32, #tpu.memory_space<vmem>>) attributes {dimension_semantics = [], scalar_prefetch = 0 : i64, scratch_operands = 0 : i64, tpu.core_type = #tpu.core_type<tc>} {
    %c0 = arith.constant 0 : index
    %c0_0 = arith.constant 0 : index
    %0 = vector.load %arg0[%c0, %c0_0] : memref<8x32xf32, #tpu.memory_space<vmem>>, vector<8x32xf32>
    %1 = arith.truncf %0 : vector<8x32xf32> to vector<8x32xbf16>
    %c0_1 = arith.constant 0 : index
    %c0_2 = arith.constant 0 : index
    %2 = vector.load %arg1[%c0_1, %c0_2] : memref<32x64xbf16, #tpu.memory_space<vmem>>, vector<32x64xbf16>
    %cst = arith.constant dense<0.000000e+00> : vector<8x64xf32>
    %3 = tpu.matmul %1, %2, %cst {dimension_numbers = #tpu.dot_dimension_numbers<[1], [0], [0], [1], [0, 0, 1, 1], [], []>} : vector<8x32xbf16>, vector<32x64xbf16>, vector<8x64xf32> -> vector<8x64xf32>
    %cst_3 = arith.constant dense<0.000000e+00> : vector<64xf32>
    %4 = vector.multi_reduction <add>, %3, %cst_3 [0] : vector<8x64xf32> to vector<64xf32>
    %5 = vector.shape_cast %4 : vector<64xf32> to vector<1x64xf32>
    %6 = arith.mulf %3, %3 : vector<8x64xf32>
    %cst_4 = arith.constant dense<0.000000e+00> : vector<64xf32>
    %7 = vector.multi_reduction <add>, %6, %cst_4 [0] : vector<8x64xf32> to vector<64xf32>
    %8 = vector.shape_cast %7 : vector<64xf32> to vector<1x64xf32>
    %cst_5 = arith.constant 1.250000e-01 : f32
    %9 = vector.broadcast %cst_5 : f32 to vector<1x64xf32>
    %10 = arith.mulf %5, %9 : vector<1x64xf32>
    %cst_6 = arith.constant 1.250000e-01 : f32
    %11 = vector.broadcast %cst_6 : f32 to vector<1x64xf32>
    %12 = arith.mulf %8, %11 : vector<1x64xf32>
    %13 = arith.mulf %10, %10 : vector<1x64xf32>
    %14 = arith.subf %12, %13 : vector<1x64xf32>
    %cst_7 = arith.constant 0.000000e+00 : f32
    %15 = vector.broadcast %cst_7 : f32 to vector<1x64xf32>
    %16 = arith.maximumf %14, %15 : vector<1x64xf32>
    %c0_8 = arith.constant 0 : index
    %c0_9 = arith.constant 0 : index
    %17 = vector.load %arg2[%c0_8, %c0_9] : memref<1x64xf32, #tpu.memory_space<vmem>>, vector<1x64xf32>
    %cst_10 = arith.constant 9.99999974E-6 : f32
    %18 = vector.broadcast %cst_10 : f32 to vector<1x64xf32>
    %19 = arith.addf %16, %18 : vector<1x64xf32>
    %20 = math.rsqrt %19 : vector<1x64xf32>
    %21 = arith.mulf %17, %20 : vector<1x64xf32>
    %c0_11 = arith.constant 0 : index
    %c0_12 = arith.constant 0 : index
    %22 = vector.load %arg3[%c0_11, %c0_12] : memref<1x64xf32, #tpu.memory_space<vmem>>, vector<1x64xf32>
    %23 = arith.mulf %10, %21 : vector<1x64xf32>
    %24 = arith.subf %22, %23 : vector<1x64xf32>
    %25 = vector.broadcast %21 : vector<1x64xf32> to vector<8x64xf32>
    %26 = arith.mulf %3, %25 : vector<8x64xf32>
    %27 = vector.broadcast %24 : vector<1x64xf32> to vector<8x64xf32>
    %28 = arith.addf %26, %27 : vector<8x64xf32>
    %cst_13 = arith.constant 0.000000e+00 : f32
    %29 = vector.broadcast %cst_13 : f32 to vector<8x64xf32>
    %30 = arith.maximumf %28, %29 : vector<8x64xf32>
    %31 = arith.truncf %30 : vector<8x64xf32> to vector<8x64xbf16>
    %c0_14 = arith.constant 0 : index
    %c0_15 = arith.constant 0 : index
    %32 = vector.load %arg4[%c0_14, %c0_15] : memref<64x128xbf16, #tpu.memory_space<vmem>>, vector<64x128xbf16>
    %cst_16 = arith.constant dense<0.000000e+00> : vector<8x128xf32>
    %33 = tpu.matmul %31, %32, %cst_16 {dimension_numbers = #tpu.dot_dimension_numbers<[1], [0], [0], [1], [0, 0, 1, 1], [], []>} : vector<8x64xbf16>, vector<64x128xbf16>, vector<8x128xf32> -> vector<8x128xf32>
    %c0_17 = arith.constant 0 : index
    %c0_18 = arith.constant 0 : index
    %34 = vector.load %arg5[%c0_17, %c0_18] : memref<1x128xf32, #tpu.memory_space<vmem>>, vector<1x128xf32>
    %35 = vector.broadcast %34 : vector<1x128xf32> to vector<8x128xf32>
    %36 = arith.addf %33, %35 : vector<8x128xf32>
    %c0_19 = arith.constant 0 : index
    %c0_20 = arith.constant 0 : index
    %37 = vector.load %arg6[%c0_19, %c0_20] : memref<8x128xf32, #tpu.memory_space<vmem>>, vector<8x128xf32>
    tpu.vector_store %arg6[%c0_19, %c0_20], %36 {strides = array<i32>} : memref<8x128xf32, #tpu.memory_space<vmem>>, vector<8x128xf32>,
    return
  }
}

</mosaic_0001>

<bundles_post_ra>
// kernel: _forward_padded.1
= control target key start
LH: loop header
LB: loop body
LE: loop exit
PB: predicated region body
PF: predicated region fallthrough
CT: control target
= control target key end

     0   :  { %11 = vsyncpa [#allocation3], 0  ;;  %s525_s0 = inlined_call_operand.hbm [shape: f32[8,32], index: 0, kind: input, shape index: {}]   ;;  %s526_s1 = inlined_call_operand.hbm [shape: bf16[32,64], index: 1, kind: input, shape index: {}]   ;;  %s527_s2 = inlined_call_operand.vmem [shape: f32[1,64], index: 2, kind: input, shape index: {}]   ;;  %s528_s3 = inlined_call_operand.vmem [shape: f32[1,64], index: 3, kind: input, shape index: {}]   ;;  %s529_s4 = inlined_call_operand.hbm [shape: bf16[64,128], index: 4, kind: input, shape index: {}]   ;;  %s530_s5 = inlined_call_operand.vmem [shape: f32[1,128], index: 5, kind: input, shape index: {}]   ;;  %s531_s6 = inlined_call_operand.hbm [shape: f32[8,128], index: 6, kind: output, shape index: {}]  }
   0x1   :  { %12 = vsyncpa [#allocation6], 0 }
   0x2   :  { %13 = vsyncpa [#allocation4], 0  ;;  %s416_s21 = smov [#allocation5]   ;;  %s322_s25 = scalar_lea.hbm %s526_s1, 256 }
   0x3   :  { %s29_s22 = sshll.u32 %s416_s21, 4  ;;  %p323_p0 = scmp.ne.s32.totalorder %s526_s1, %s322_s25  ;;  %s30_s22 = int_to_ptr.vmem [resolvable:$true] %s29_s22 }
   0x4   :  { %p326_p1 = scmp.lt.u32.totalorder %s322_s25, %s526_s1 }
   0x6   :  { %p328_p2 = pnand %p326_p1, %p323_p0 }
   0x8   :  { %331 = shalt.err (!%p328_p2)
}
   0x9   :  { %s332_s30 = scalar_lea.vmem %s30_s22, 256  ;;  %p337_p4 = scmp.lt.s32.totalorder %s30_s22, %s30_s22 }
   0xa   :  { %p333_p3 = scmp.ne.s32.totalorder %s30_s22, %s332_s30  ;;  %p338_p5 = scmp.lt.s32.totalorder %s332_s30, %s332_s30 }
   0xc   :  { %p339_p6 = por %p338_p5, %p337_p4 }
   0xe   :  { %p340_p7 = pnand %p339_p6, %p333_p3 }
  0x10   :  { %343 = shalt.err (!%p340_p7)
}
  0x11   :  { %s417_s7 = smov 64   ;;  %s418_s8 = smov 4  }
  0x12   :  { %35 = dma.hbm_to_vmem [thread:$0]  %s526_s1, 256, %s30_s22, [#allocation6], %s417_s7, %s417_s7, %s418_s8  }
  0x13   :  { %s419_s11 = smov [#allocation2]   ;;  %s420_s13 = smov [#allocation7]  }
  0x14   :  { %s20_s12 = sshll.u32 %s419_s11, 4  ;;  %s45_s14 = sshll.u32 %s420_s13, 4  ;;  %s21_s12 = int_to_ptr.vmem [resolvable:$true] %s20_s12  ;;  %s46_s14 = int_to_ptr.vmem [resolvable:$true] %s45_s14 }
  0x15   :  { %s344_s17 = scalar_lea.hbm %s525_s0, 128 }
  0x16   :  { %p345_p8 = scmp.ne.s32.totalorder %s525_s0, %s344_s17  ;;  %p348_p9 = scmp.lt.u32.totalorder %s344_s17, %s525_s0 }
  0x18   :  { %p350_p10 = pnand %p348_p9, %p345_p8 }
  0x1a   :  { %353 = shalt.err (!%p350_p10)
}
  0x1b   :  { %s354_s1 = scalar_lea.vmem %s21_s12, 128  ;;  %p359_p12 = scmp.lt.s32.totalorder %s21_s12, %s21_s12 }
  0x1c   :  { %p355_p11 = scmp.ne.s32.totalorder %s21_s12, %s354_s1  ;;  %p360_p13 = scmp.lt.s32.totalorder %s354_s1, %s354_s1 }
  0x1e   :  { %p361_p0 = por %p360_p13, %p359_p12 }
  0x20   :  { %p362_p1 = pnand %p361_p0, %p355_p11 }
  0x22   :  { %365 = shalt.err (!%p362_p1)
}
  0x23   :  { %23 = dma.hbm_to_vmem [thread:$0]  %s525_s0, 128, %s21_s12, [#allocation3]  }
  0x24   :  { %s366_s26 = scalar_lea.hbm %s529_s4, 512 }
  0x25   :  { %p367_p2 = scmp.ne.s32.totalorder %s529_s4, %s366_s26  ;;  %p370_p3 = scmp.lt.u32.totalorder %s366_s26, %s529_s4 }
  0x27   :  { %p372_p4 = pnand %p370_p3, %p367_p2 }
  0x29   :  { %375 = shalt.err (!%p372_p4)
}
  0x2a   :  { %s376_s9 = scalar_lea.vmem %s46_s14, 512  ;;  %p381_p6 = scmp.lt.s32.totalorder %s46_s14, %s46_s14 }
  0x2b   :  { %p377_p5 = scmp.ne.s32.totalorder %s46_s14, %s376_s9  ;;  %p382_p7 = scmp.lt.s32.totalorder %s376_s9, %s376_s9 }
  0x2d   :  { %p383_p8 = por %p382_p7, %p381_p6 }
  0x2f   :  { %p384_p9 = pnand %p383_p8, %p377_p5 }
  0x31   :  { %387 = shalt.err (!%p384_p9)
}
  0x32   :  { %51 = dma.hbm_to_vmem [thread:$0]  %s529_s4, 512, %s46_s14, [#allocation6], %s417_s7, %s417_s7, %s418_s8  }
  0x33   :  { %410 = dma.done.wait [#allocation3], 128  }
  0x34   :  { %411 = vsyncadd [#allocation3], 4294967168 }
  0x35   :  { %412 = dma.done.wait [#allocation6], 768  }
  0x36   :  { %413 = vsyncadd [#allocation6], 4294966528  ;;  %v421_v0 = vmov 0.0   ;;  %vm422_vm0 = vmmov 0   ;;  %v314_v1 = vld [vmem:[#allocation5] sm:$0xff]   ;;  %v315_v2 = vld [vmem:[#allocation5 + $0x8] sm:$0xff]   ;;  %v155_v34 = vlaneseq }
  0x37   :  { %286 = vmatprep.subr.bf16.mxu0 %v421_v0  ;;  %290 = vmatprep.mubr.msk.bf16.mxu0 %vm422_vm0, %v421_v0  ;;  %v64_v3 = vld [vmem:[#allocation2] sm:$0xff]  ;;  %vm82_vm1 = vcmask 261120   ;;  %v316_v5 = vld [vmem:[#allocation7] sm:$0xff]   ;;  %v318_v7 = vld [vmem:[#allocation7 + $0x10] sm:$0xff]   ;;  %vm126_vm2 = vcmask 523264  }
  0x38   :  { %294 = vmatprep.subr.bf16.mxu1 %v421_v0  ;;  %302 = vmatprep.mubr.msk.bf16.mxu1 %vm422_vm0, %v421_v0  ;;  %v65_v4 = vpack.c.bf16 %v64_v3, %v64_v3  ;;  %v317_v6 = vld [vmem:[#allocation7 + $0x8] sm:$0xff]   ;;  %v319_v8 = vld [vmem:[#allocation7 + $0x18] sm:$0xff]   ;;  %v156_v35 = vshrl.u32 %v155_v34, 7 }
  0x39   :  { %287 = vmatpush3.bf16.msra.mxu0 %v314_v1  ;;  %295 = vmatpush3.bf16.msra.mxu1 %v316_v5  ;;  %v147_v36 = vld [vmem:[%s527_s2] sm:$0x1]  ;;  %s423_s2 = smov [#allocation8]  }
  0x3a   :  { %288 = vmatprep.subr.bf16.mxu0 %v421_v0  ;;  %296 = vmatprep.subr.bf16.mxu1 %v421_v0  ;;  %v157_v37 = vsub.s32 0, %v156_v35  ;;  %v151_v40 = vld [vmem:[%s528_s3] sm:$0x1]  ;;  %s259_s14 = sshll.u32 %s423_s2, 4  ;;  %s260_s14 = int_to_ptr.vmem [resolvable:$true] %s259_s14 }
  0x3b   :  { %v272_v49 = vld [vmem:[%s530_s5] ss:$0 sm:$0xff]  ;;  %s388_s3 = scalar_lea.vmem %s260_s14, 128  ;;  %p393_p11 = scmp.lt.s32.totalorder %s260_s14, %s260_s14 }
  0x3c   :  { %p389_p10 = scmp.ne.s32.totalorder %s260_s14, %s388_s3  ;;  %p394_p12 = scmp.lt.s32.totalorder %s388_s3, %s388_s3 }
  0x3d   :  { %289 = vmatpush3.bf16.msra.mxu0 %v315_v2  ;;  %297 = vmatpush3.bf16.msra.mxu1 %v317_v6 }
  0x3e   :  { %298 = vmatprep.subr.bf16.mxu1 %v421_v0  ;;  %p395_p13 = por %p394_p12, %p393_p11 }
  0x40   :  { %291 = vmatmul.mubr.msk.bf16.vlgmr.msra.gmra.mrb[0].mxu0 %vm82_vm1, %v65_v4  ;;  %p396_p0 = pnand %p395_p13, %p389_p10 }
  0x41   :  { %299 = vmatpush3.bf16.msra.mxu1 %v318_v7 }
  0x42   :  { %300 = vmatprep.subr.bf16.mxu1 %v421_v0 }
  0x45   :  { %301 = vmatpush3.bf16.msra.mxu1 %v319_v8 }
 0x113   :  { %v120_v9 = vpop.f32.mrb[0].mxu0 }
 0x114   :  { %v127_v10 = vsel %vm126_vm2, %v120_v9, 0.0  ;;  %v134_v11 = vmul.f32 %v120_v9, %v120_v9  ;;  %v292_v12 = vpop.f32.mrb[1].mxu0 }
 0x115   :  { %v128_v13 = vrot.slane %v127_v10, 4  ;;  %v123_v14 = vpop.f32.mrb[2].mxu0 }
 0x116   :  { %v135_v15 = vsel %vm126_vm2, %v134_v11, 0.0  ;;  %v293_v16 = vpop.f32.mrb[3].mxu0 }
 0x117   :  { %v129_v17 = vadd.f32 %v128_v13, %v127_v10  ;;  %v136_v18 = vrot.slane %v135_v15, 4 }
 0x119   :  { %v130_v19 = vrot.slane %v129_v17, 2  ;;  %v137_v20 = vadd.f32 %v136_v18, %v135_v15 }
 0x11b   :  { %v131_v21 = vadd.f32 %v130_v19, %v129_v17  ;;  %v138_v22 = vrot.slane %v137_v20, 2 }
 0x11d   :  { %v132_v23 = vrot.slane %v131_v21, 1  ;;  %v139_v24 = vadd.f32 %v138_v22, %v137_v20 }
 0x11f   :  { %v133_v25 = vadd.f32 %v132_v23, %v131_v21  ;;  %v140_v26 = vrot.slane %v139_v24, 1 }
 0x121   :  { %v141_v27 = vadd.f32 %v140_v26, %v139_v24  ;;  %v142_v28 = vmul.f32 0.125, %v133_v25 }
 0x123   :  { %v143_v29 = vmul.f32 0.125, %v141_v27  ;;  %v144_v30 = vmul.f32 %v142_v28, %v142_v28 }
 0x125   :  { %v145_v31 = vsub.f32 %v143_v29, %v144_v30 }
 0x127   :  { %v146_v32 = vmax.f32 %v145_v31, 0.0 }
 0x129   :  { %v148_v33 = vadd.f32 1e-05, %v146_v32 }
 0x12b   :  { %320 = vrsqrt.f32 %v148_v33 }
 0x135   :  { %v321_v38 = vpop.eup %320 }
 0x136   :  { %v150_v39 = vmul.f32 %v321_v38, %v147_v36 }
 0x138   :  { %v152_v41 = vmul.f32 %v150_v39, %v142_v28  ;;  %v158_v42 = vrot.slane %v150_v39, %v157_v37 }
 0x13a   :  { %v153_v43 = vsub.f32 %v151_v40, %v152_v41  ;;  %v160_v44 = vmul.f32 %v158_v42, %v120_v9 }
 0x13c   :  { %v165_v45 = vrot.slane %v153_v43, %v157_v37 }
 0x13e   :  { %v167_v46 = vadd.f32 %v165_v45, %v160_v44 }
 0x140   :  { %v168_v47 = vmax.f32 %v167_v46, 0.0 }
 0x142   :  { %v169_v48 = vpack.c.bf16 %v168_v47, %v168_v47 }
 0x144   :  { %303 = vmatmul.mubr.msk.bf16.vlgmr.msra.gmra.mrb[0].mxu1 %vm126_vm2, %v169_v48 }
 0x217   :  { %v246_v50 = vpop.f32.mrb[0].mxu1 }
 0x218   :  { %v247_v51 = vadd.f32 %v272_v49, %v246_v50  ;;  %v304_v52 = vpop.f32.mrb[1].mxu1 }
 0x219   :  { %v249_v53 = vpop.f32.mrb[2].mxu1 }
 0x21a   :  { %252 = vst [vmem:[#allocation8] sm:$0xff] %v247_v51  ;;  %v305_v54 = vpop.f32.mrb[3].mxu1 }
 0x21b   :  { %399 = shalt.err (!%p396_p0)
}
 0x21c   :  { %s400_s5 = scalar_lea.hbm %s531_s6, 128 }
 0x21d   :  { %p401_p1 = scmp.ne.s32.totalorder %s531_s6, %s400_s5  ;;  %p404_p2 = scmp.lt.u32.totalorder %s400_s5, %s531_s6 }
 0x21f   :  { %p406_p3 = pnand %p404_p2, %p401_p1 }
 0x221   :  { %409 = shalt.err (!%p406_p3)
}
 0x222   :  { %262 = dma.vmem_to_hbm [thread:$0]  %s260_s14, 128, %s531_s6, [#allocation4]  }
 0x223   :  { %414 = dma.done.wait [#allocation4], 128  }
 0x224   :  { %415 = vsyncadd [#allocation4], 4294967168 }
 0x225   :  { %266 = vsyncpa [#allocation3], 1 }
 0x226   :  { %267 = vsyncpa [#allocation6], 1 }
 0x227   :  { %268 = vsyncpa [#allocation4], 1 }

</bundles_post_ra>
